<compile_context>
chip_gen: v5e
topology: v5e:2x2
jax: 0.10.0
libtpu: 0.0.40
codegen_flags: <defaults>
</compile_context>

<pallas_src>
import functools

import jax
import jax.numpy as jnp
from jax.experimental import pallas as pl
from jax.experimental.pallas import tpu as pltpu

NEG_SLOPE = 0.01          # F.leaky_relu default negative_slope
HIDDEN = 100              # nn.Linear(t_dim, 100)
OUT_DIM = 32              # nn.Linear(100, 32)
LANES = 128               # TPU vreg lane width
MAX_BLOCK_ROWS = 8192     # default logical batch rows per grid step


def _leaky_relu(x):
    return jnp.where(x > 0, x, NEG_SLOPE * x)


def _round_up(x, m):
    return (x + m - 1) // m * m


def _t_module_kernel(t_ref, w1_ref, b1_ref, w2_ref, b2_ref, o_ref, *, precision):
    """Both linear layers + leaky_relu on one folded batch tile.

    t_ref : (tm, fold*t_dim)          fold batch rows packed along lanes
    w1_ref: (fold*t_dim, fold*hidp)   block-diagonal layer-1 weights
    b1_ref: (1, fold*hidp)            f32
    w2_ref: (fold*hidp, fold*32=128)  block-diagonal layer-2 weights
    b2_ref: (1, 128)                  f32
    o_ref : (tm, 128)                 lane-dense; wrapper views it as (fold*tm, 32)
    """
    h = jnp.dot(t_ref[...], w1_ref[...],
                preferred_element_type=jnp.float32, precision=precision)
    h = _leaky_relu(h + b1_ref[...])
    o = jnp.dot(h.astype(w2_ref.dtype), w2_ref[...],
                preferred_element_type=jnp.float32, precision=precision)
    o = _leaky_relu(o + b2_ref[...])
    o_ref[...] = o.astype(o_ref.dtype)


@functools.partial(
    jax.jit,
    static_argnames=("block_rows", "compute_dtype", "precision", "core_parallel"))
def t_module_forward(t, w1, b1, w2, b2, *, block_rows=MAX_BLOCK_ROWS,
                     compute_dtype=jnp.float32, precision=None,
                     core_parallel=False):
    """t: (B, t_dim); w1: (t_dim, 100); b1: (100,); w2: (100, 32); b2: (32,).

    Weights are stored (in_features, out_features) == transpose of PyTorch's
    nn.Linear storage; the math (x @ W + b) is identical.
    """
    B, t_dim = t.shape
    hid = w1.shape[1]
    out_dim = w2.shape[1]
    out_dtype = t.dtype

    # Fold factor: how many batch rows share one lane-dense (128-wide) out row.
    fold = LANES // out_dim if (out_dim <= LANES and LANES % out_dim == 0) else 1
    hid_pad = _round_up(hid, LANES)          # 100 -> 128 (zero pad, math unchanged)

    # ---- weight prep (tiny, block-diagonal "folded" weights) -----------------
    b1 = jnp.reshape(b1, (1, hid)).astype(jnp.float32)
    b2 = jnp.reshape(b2, (1, out_dim)).astype(jnp.float32)
    w1p = jnp.pad(w1, ((0, 0), (0, hid_pad - hid)))
    b1p = jnp.pad(b1, ((0, 0), (0, hid_pad - hid)))
    w2p = jnp.pad(w2, ((0, hid_pad - hid), (0, 0)))
    eye = jnp.eye(fold, dtype=w1p.dtype)
    w1f = jnp.kron(eye, w1p).astype(compute_dtype)    # (fold*t_dim, fold*hid_pad)
    w2f = jnp.kron(eye, w2p).astype(compute_dtype)    # (fold*hid_pad, fold*out_dim)
    b1f = jnp.tile(b1p, (1, fold))                    # (1, fold*hid_pad), f32
    b2f = jnp.tile(b2, (1, fold))                     # (1, fold*out_dim), f32

    # ---- fold `fold` consecutive batch rows into the lane axis ---------------
    # Row-major (B, t_dim) -> (B/fold, fold*t_dim) keeps the linear element
    # order, so the reshape is free (no HBM copy).  Only when B % fold != 0 do
    # we pad <= fold-1 zero rows.
    b_fold = _round_up(B, fold)
    if b_fold != B:
        t = jnp.pad(t, ((0, b_fold - B), (0, 0)))
    n_rows = b_fold // fold                           # "physical" rows
    t_folded = jnp.reshape(t, (n_rows, fold * t_dim)).astype(compute_dtype)

    out_cols = fold * out_dim                         # 128: lane-dense output

    # ---- batch tiling over physical rows (no padded copy; the last block is --
    # ---- boundary-masked by Pallas) ------------------------------------------
    max_rows = max(block_rows // fold, 8)
    n_tiles = pl.cdiv(n_rows, max_rows)
    if n_tiles == 1:
        tm = n_rows                                   # exact single block
    else:
        tm = _round_up(pl.cdiv(n_rows, n_tiles), 8)   # last block partial/masked
    grid = (pl.cdiv(n_rows, tm),)

    # ---- VMEM budget: lane-padded, double-buffered footprint of one tile -----
    in_item = jnp.dtype(compute_dtype).itemsize
    out_item = jnp.dtype(out_dtype).itemsize
    vmem_est = (
        2 * tm * _round_up(fold * t_dim, LANES) * in_item   # t blocks (x2 bufs)
        + 2 * tm * out_cols * out_item                      # out blocks (x2 bufs)
        + 2 * tm * fold * hid_pad * 4                       # f32 hidden live values
        + 2 * (w1f.size + w2f.size) * in_item               # resident weights
        + (4 << 20)                                         # headroom
    )
    # Cap at v7x's 64 MiB physical VMEM; defaults land at the 32 MiB floor.
    vmem_limit = int(min(max(vmem_est, 32 << 20), 64 << 20))

    flops = 2 * grid[0] * tm * (
        (fold * t_dim) * (fold * hid_pad) + (fold * hid_pad) * out_cols)
    bytes_accessed = (
        t_folded.size * in_item + n_rows * out_cols * out_item
        + (w1f.size + w2f.size) * in_item + (b1f.size + b2f.size) * 4)

    dims = (pltpu.CORE_PARALLEL,) if core_parallel else ("parallel",)
    kernel = functools.partial(_t_module_kernel, precision=precision)

    # TODO(synk): pipeline_mode=pl.Buffered(1) on the four resident weight/bias
    # specs would drop their (unused) second pipeline buffer (~0.5 MiB VMEM);
    # left at the default for lowering safety.
    out = pl.pallas_call(
        kernel,
        out_shape=jax.ShapeDtypeStruct((n_rows, out_cols), out_dtype),
        grid=grid,
        in_specs=[
            pl.BlockSpec((tm, fold * t_dim), lambda i: (i, 0)),            # tiled
            pl.BlockSpec((fold * t_dim, fold * hid_pad), lambda i: (0, 0)),
            pl.BlockSpec((1, fold * hid_pad), lambda i: (0, 0)),
            pl.BlockSpec((fold * hid_pad, out_cols), lambda i: (0, 0)),
            pl.BlockSpec((1, out_cols), lambda i: (0, 0)),
        ],
        out_specs=pl.BlockSpec((tm, out_cols), lambda i: (i, 0)),
        compiler_params=pltpu.CompilerParams(
            dimension_semantics=dims,
            vmem_limit_bytes=vmem_limit,
        ),
        cost_estimate=pl.CostEstimate(
            flops=int(flops), transcendentals=0,
            bytes_accessed=int(bytes_accessed)),
    )(t_folded, w1f, b1f, w2f, b2f)

    # Free row-major unfold back to the logical (B, 32) layout.
    return jnp.reshape(out, (b_fold, out_dim))[:B]


def init_params(key, t_dim):
    """PyTorch nn.Linear default init U(-1/sqrt(fan_in), 1/sqrt(fan_in)).

    Stored as (in_features, out_features) = transpose of torch's weight."""
    k1, k2, k3, k4 = jax.random.split(key, 4)
    bound1 = 1.0 / (t_dim ** 0.5)
    bound2 = 1.0 / (HIDDEN ** 0.5)
    w1 = jax.random.uniform(k1, (t_dim, HIDDEN), jnp.float32, -bound1, bound1)
    b1 = jax.random.uniform(k2, (HIDDEN,), jnp.float32, -bound1, bound1)
    w2 = jax.random.uniform(k3, (HIDDEN, OUT_DIM), jnp.float32, -bound2, bound2)
    b2 = jax.random.uniform(k4, (OUT_DIM,), jnp.float32, -bound2, bound2)
    return w1, b1, w2, b2


def reference_forward(t, w1, b1, w2, b2):
    h = jax.nn.leaky_relu(t @ w1 + b1.reshape(1, -1), NEG_SLOPE)
    return jax.nn.leaky_relu(h @ w2 + b2.reshape(1, -1), NEG_SLOPE)


def _snap_bf16(x):
    # Snap values to the bf16 grid so the numeric check is (mostly) independent
    # of which MXU precision path the compilers pick for f32 matmuls.
    return x.astype(jnp.bfloat16).astype(jnp.float32)


if __name__ == "__main__":
    key = jax.random.PRNGKey(0)
    k_t, k_p, k_big = jax.random.split(key, 3)

    batch, t_dim = 8, 16
    t = _snap_bf16(jax.random.normal(k_t, (batch, t_dim), jnp.float32))
    w1, b1, w2, b2 = (_snap_bf16(p) for p in init_params(k_p, t_dim))

    # Small batch: single exact block.
    out = jax.block_until_ready(t_module_forward(t, w1, b1, w2, b2))
    ref = reference_forward(t, w1, b1, w2, b2)
    assert out.shape == (batch, OUT_DIM), out.shape
    assert jnp.allclose(out, ref, atol=1e-2, rtol=1e-2), "f32 small-batch mismatch"

    # Larger ragged batch (B % 4 != 0) with a small tile so the multi-step
    # pipelined grid and the masked partial last block are exercised.
    big_batch = 4099
    t_big = _snap_bf16(jax.random.normal(k_big, (big_batch, t_dim), jnp.float32))
    out_big = jax.block_until_ready(
        t_module_forward(t_big, w1, b1, w2, b2, block_rows=512))
    ref_big = reference_forward(t_big, w1, b1, w2, b2)
    assert out_big.shape == (big_batch, OUT_DIM), out_big.shape
    assert jnp.allclose(out_big, ref_big, atol=1e-2, rtol=1e-2), "f32 big-batch mismatch"

    # bf16 compute path (halves the dominant HBM read of t); looser tolerance
    # because the hidden activations are rounded to bf16 before the second dot.
    out_bf16 = jax.block_until_ready(
        t_module_forward(t, w1, b1, w2, b2, compute_dtype=jnp.bfloat16))
    assert out_bf16.shape == (batch, OUT_DIM), out_bf16.shape
    assert jnp.allclose(out_bf16, ref, atol=5e-2, rtol=5e-2), "bf16 path mismatch"

    print("KERNEL_OK")
</pallas_src>

<mosaic_0001>
module attributes {stable_mosaic.version = 11 : i64} {
  func.func @_t_module_kernel(%arg0: i32, %arg1: memref<2x64xf32, #tpu.memory_space<vmem>>, %arg2: memref<64x512xf32, #tpu.memory_space<vmem>>, %arg3: memref<1x512xf32, #tpu.memory_space<vmem>>, %arg4: memref<512x128xf32, #tpu.memory_space<vmem>>, %arg5: memref<1x128xf32, #tpu.memory_space<vmem>>, %arg6: memref<2x128xf32, #tpu.memory_space<vmem>>) attributes {dimension_semantics = [#tpu.dimension_semantics<parallel>], iteration_bounds = array<i64: 1>, scalar_prefetch = 0 : i64, scratch_operands = 0 : i64, tpu.core_type = #tpu.core_type<tc>, window_params = [{transform_indices = @transform_0, window_bounds = array<i64: 2, 64>}, {pipeline_mode = #tpu.pipeline_mode<synchronous>, transform_indices = @transform_1, window_bounds = array<i64: 64, 512>}, {pipeline_mode = #tpu.pipeline_mode<synchronous>, transform_indices = @transform_2, window_bounds = array<i64: 1, 512>}, {pipeline_mode = #tpu.pipeline_mode<synchronous>, transform_indices = @transform_3, window_bounds = array<i64: 512, 128>}, {pipeline_mode = #tpu.pipeline_mode<synchronous>, transform_indices = @transform_4, window_bounds = array<i64: 1, 128>}, {transform_indices = @transform_5, window_bounds = array<i64: 2, 128>}]} {
    %c0 = arith.constant 0 : index
    %c0_0 = arith.constant 0 : index
    %0 = vector.load %arg1[%c0, %c0_0] : memref<2x64xf32, #tpu.memory_space<vmem>>, vector<2x64xf32>
    %c0_1 = arith.constant 0 : index
    %c0_2 = arith.constant 0 : index
    %1 = vector.load %arg2[%c0_1, %c0_2] : memref<64x512xf32, #tpu.memory_space<vmem>>, vector<64x512xf32>
    %cst = arith.constant dense<0.000000e+00> : vector<2x512xf32>
    %2 = tpu.matmul %0, %1, %cst {dimension_numbers = #tpu.dot_dimension_numbers<[1], [0], [0], [1], [0, 0, 1, 1], [], []>} : vector<2x64xf32>, vector<64x512xf32>, vector<2x512xf32> -> vector<2x512xf32>
    %c0_3 = arith.constant 0 : index
    %c0_4 = arith.constant 0 : index
    %3 = vector.load %arg3[%c0_3, %c0_4] : memref<1x512xf32, #tpu.memory_space<vmem>>, vector<1x512xf32>
    %4 = vector.broadcast %3 : vector<1x512xf32> to vector<2x512xf32>
    %5 = arith.addf %2, %4 : vector<2x512xf32>
    %cst_5 = arith.constant 0.000000e+00 : f32
    %6 = vector.broadcast %cst_5 : f32 to vector<2x512xf32>
    %7 = arith.cmpf ogt, %5, %6 : vector<2x512xf32>
    %cst_6 = arith.constant 0.00999999977 : f32
    %8 = vector.broadcast %cst_6 : f32 to vector<2x512xf32>
    %9 = arith.mulf %8, %5 : vector<2x512xf32>
    %10 = arith.select %7, %5, %9 : vector<2x512xi1>, vector<2x512xf32>
    %c0_7 = arith.constant 0 : index
    %c0_8 = arith.constant 0 : index
    %11 = vector.load %arg4[%c0_7, %c0_8] : memref<512x128xf32, #tpu.memory_space<vmem>>, vector<512x128xf32>
    %cst_9 = arith.constant dense<0.000000e+00> : vector<2x128xf32>
    %12 = tpu.matmul %10, %11, %cst_9 {dimension_numbers = #tpu.dot_dimension_numbers<[1], [0], [0], [1], [0, 0, 1, 1], [], []>} : vector<2x512xf32>, vector<512x128xf32>, vector<2x128xf32> -> vector<2x128xf32>
    %c0_10 = arith.constant 0 : index
    %c0_11 = arith.constant 0 : index
    %13 = vector.load %arg5[%c0_10, %c0_11] : memref<1x128xf32, #tpu.memory_space<vmem>>, vector<1x128xf32>
    %14 = vector.broadcast %13 : vector<1x128xf32> to vector<2x128xf32>
    %15 = arith.addf %12, %14 : vector<2x128xf32>
    %cst_12 = arith.constant 0.000000e+00 : f32
    %16 = vector.broadcast %cst_12 : f32 to vector<2x128xf32>
    %17 = arith.cmpf ogt, %15, %16 : vector<2x128xf32>
    %cst_13 = arith.constant 0.00999999977 : f32
    %18 = vector.broadcast %cst_13 : f32 to vector<2x128xf32>
    %19 = arith.mulf %18, %15 : vector<2x128xf32>
    %20 = arith.select %17, %15, %19 : vector<2x128xi1>, vector<2x128xf32>
    %c0_14 = arith.constant 0 : index
    %c0_15 = arith.constant 0 : index
    %21 = vector.load %arg6[%c0_14, %c0_15] : memref<2x128xf32, #tpu.memory_space<vmem>>, vector<2x128xf32>
    tpu.vector_store %arg6[%c0_14, %c0_15], %20 {strides = array<i32>} : memref<2x128xf32, #tpu.memory_space<vmem>>, vector<2x128xf32>,
    return
  }
  func.func @transform_0(%arg0: i32) -> (i32, i32) {
    %c0_i32 = arith.constant 0 : i32
    %c0_i32_0 = arith.constant 0 : i32
    return %arg0, %c0_i32 : i32, i32
  }
  func.func @transform_1(%arg0: i32) -> (i32, i32) {
    %c0_i32 = arith.constant 0 : i32
    %c0_i32_0 = arith.constant 0 : i32
    %c0_i32_1 = arith.constant 0 : i32
    return %c0_i32, %c0_i32_0 : i32, i32
  }
  func.func @transform_2(%arg0: i32) -> (i32, i32) {
    %c0_i32 = arith.constant 0 : i32
    %c0_i32_0 = arith.constant 0 : i32
    %c0_i32_1 = arith.constant 0 : i32
    return %c0_i32, %c0_i32_0 : i32, i32
  }
  func.func @transform_3(%arg0: i32) -> (i32, i32) {
    %c0_i32 = arith.constant 0 : i32
    %c0_i32_0 = arith.constant 0 : i32
    %c0_i32_1 = arith.constant 0 : i32
    return %c0_i32, %c0_i32_0 : i32, i32
  }
  func.func @transform_4(%arg0: i32) -> (i32, i32) {
    %c0_i32 = arith.constant 0 : i32
    %c0_i32_0 = arith.constant 0 : i32
    %c0_i32_1 = arith.constant 0 : i32
    return %c0_i32, %c0_i32_0 : i32, i32
  }
  func.func @transform_5(%arg0: i32) -> (i32, i32) {
    %c0_i32 = arith.constant 0 : i32
    %c0_i32_0 = arith.constant 0 : i32
    return %arg0, %c0_i32 : i32, i32
  }
}

</mosaic_0001>

<bundles_post_ra>
// kernel: t_module_forward.1
= control target key start
LH: loop header
LB: loop body
LE: loop exit
PB: predicated region body
PF: predicated region fallthrough
CT: control target
= control target key end

     0   :  { %vm63_vm0 = vcmask 523264   ;;  %s654_s1 = inlined_call_operand.vmem [shape: f32[64,512], index: 1, kind: input, shape index: {}]   ;;  %s655_s0 = inlined_call_operand.vmem [shape: f32[2,64], index: 0, kind: input, shape index: {}]   ;;  %s656_s3 = inlined_call_operand.vmem [shape: f32[512,128], index: 3, kind: input, shape index: {}]   ;;  %s657_s4 = inlined_call_operand.vmem [shape: f32[1,128], index: 4, kind: input, shape index: {}]   ;;  %s658_s2 = inlined_call_operand.vmem [shape: f32[1,512], index: 2, kind: input, shape index: {}]   ;;  %s659_s5 = inlined_call_operand.vmem [shape: f32[2,128], index: 5, kind: output, shape index: {}]  }
   0x1   :  { %v51_v0 = vld [vmem:[%s654_s1 + $0xf0] sm:$0xff]  ;;  %v52_v1 = vld [vmem:[%s654_s1 + $0xf8] sm:$0xff]  ;;  %v49_v6 = vld [vmem:[%s654_s1 + $0xe0] sm:$0xff] }
   0x2   :  { %v47_v2 = vld [vmem:[%s654_s1 + $0xd0] sm:$0xff]  ;;  %115 = vmatpush.msra.mxu2 %v51_v0  ;;  %135 = vmatpush.msra.mxu3 %v52_v1  ;;  %v48_v3 = vld [vmem:[%s654_s1 + $0xd8] sm:$0xff]  ;;  %v45_v7 = vld [vmem:[%s654_s1 + $0xc0] sm:$0xff] }
   0x3   :  { %v43_v4 = vld [vmem:[%s654_s1 + $0xb0] sm:$0xff]  ;;  %v44_v5 = vld [vmem:[%s654_s1 + $0xb8] sm:$0xff]  ;;  %v50_v8 = vld [vmem:[%s654_s1 + $0xe8] sm:$0xff]  ;;  %75 = vmatpush.msra.mxu0 %v49_v6 }
   0x4   :  { %116 = vmatpush.msra.mxu2 %v47_v2  ;;  %136 = vmatpush.msra.mxu3 %v48_v3  ;;  %v39_v9 = vld [vmem:[%s654_s1 + $0x90] sm:$0xff]  ;;  %v40_v10 = vld [vmem:[%s654_s1 + $0x98] sm:$0xff]  ;;  %v46_v11 = vld [vmem:[%s654_s1 + $0xc8] sm:$0xff] }
   0x5   :  { %95 = vmatpush.msra.mxu1 %v50_v8  ;;  %v41_v12 = vld [vmem:[%s654_s1 + $0xa0] sm:$0xff]  ;;  %76 = vmatpush.msra.mxu0 %v45_v7  ;;  %v35_v13 = vld [vmem:[%s654_s1 + $0x70] sm:$0xff]  ;;  %v36_v14 = vld [vmem:[%s654_s1 + $0x78] sm:$0xff] }
   0x6   :  { %117 = vmatpush.msra.mxu2 %v43_v4  ;;  %137 = vmatpush.msra.mxu3 %v44_v5  ;;  %v42_v15 = vld [vmem:[%s654_s1 + $0xa8] sm:$0xff]  ;;  %v37_v16 = vld [vmem:[%s654_s1 + $0x80] sm:$0xff]  ;;  %v31_v18 = vld [vmem:[%s654_s1 + $0x50] sm:$0xff] }
   0x7   :  { %96 = vmatpush.msra.mxu1 %v46_v11  ;;  %v38_v17 = vld [vmem:[%s654_s1 + $0x88] sm:$0xff]  ;;  %77 = vmatpush.msra.mxu0 %v41_v12  ;;  %v32_v19 = vld [vmem:[%s654_s1 + $0x58] sm:$0xff]  ;;  %v33_v20 = vld [vmem:[%s654_s1 + $0x60] sm:$0xff] }
   0x8   :  { %118 = vmatpush.msra.mxu2 %v39_v9  ;;  %138 = vmatpush.msra.mxu3 %v40_v10  ;;  %v34_v21 = vld [vmem:[%s654_s1 + $0x68] sm:$0xff]  ;;  %v27_v22 = vld [vmem:[%s654_s1 + $0x30] sm:$0xff]  ;;  %v28_v23 = vld [vmem:[%s654_s1 + $0x38] sm:$0xff] }
   0x9   :  { %97 = vmatpush.msra.mxu1 %v42_v15  ;;  %78 = vmatpush.msra.mxu0 %v37_v16  ;;  %v29_v24 = vld [vmem:[%s654_s1 + $0x40] sm:$0xff]  ;;  %v30_v25 = vld [vmem:[%s654_s1 + $0x48] sm:$0xff]  ;;  %v23_v26 = vld [vmem:[%s654_s1 + $0x10] sm:$0xff] }
   0xa   :  { %119 = vmatpush.msra.mxu2 %v35_v13  ;;  %139 = vmatpush.msra.mxu3 %v36_v14  ;;  %v24_v27 = vld [vmem:[%s654_s1 + $0x18] sm:$0xff]  ;;  %v20_v28 = vld [vmem:[%s655_s0] sm:$0x3]  ;;  %v26_v30 = vld [vmem:[%s654_s1 + $0x28] sm:$0xff] }
   0xb   :  { %98 = vmatpush.msra.mxu1 %v38_v17  ;;  %79 = vmatpush.msra.mxu0 %v33_v20  ;;  %v25_v29 = vld [vmem:[%s654_s1 + $0x20] sm:$0xff]  ;;  %v206_v31 = vld [vmem:[%s656_s3 + $0x178] sm:$0xff]  ;;  %v22_v34 = vld [vmem:[%s654_s1 + $0x8] sm:$0xff] }
   0xc   :  { %120 = vmatpush.msra.mxu2 %v31_v18  ;;  %140 = vmatpush.msra.mxu3 %v32_v19  ;;  %v222_v32 = vld [vmem:[%s656_s3 + $0x1f8] sm:$0xff]  ;;  %v21_v33 = vld [vmem:[%s654_s1] sm:$0xff]  ;;  %v205_v37 = vld [vmem:[%s656_s3 + $0x170] sm:$0xff] }
   0xd   :  { %99 = vmatpush.msra.mxu1 %v34_v21  ;;  %80 = vmatpush.msra.mxu0 %v29_v24  ;;  %v174_v35 = vld [vmem:[%s656_s3 + $0x78] sm:$0xff]  ;;  %v221_v38 = vld [vmem:[%s656_s3 + $0x1f0] sm:$0xff]  ;;  %v204_v41 = vld [vmem:[%s656_s3 + $0x168] sm:$0xff] }
   0xe   :  { %121 = vmatpush.msra.mxu2 %v27_v22  ;;  %141 = vmatpush.msra.mxu3 %v28_v23  ;;  %v190_v36 = vld [vmem:[%s656_s3 + $0xf8] sm:$0xff]  ;;  %v173_v39 = vld [vmem:[%s656_s3 + $0x70] sm:$0xff]  ;;  %v220_v42 = vld [vmem:[%s656_s3 + $0x1e8] sm:$0xff] }
   0xf   :  { %100 = vmatpush.msra.mxu1 %v30_v25  ;;  %81 = vmatpush.msra.mxu0 %v25_v29  ;;  %v189_v40 = vld [vmem:[%s656_s3 + $0xf0] sm:$0xff]  ;;  %v172_v43 = vld [vmem:[%s656_s3 + $0x68] sm:$0xff]  ;;  %v203_v45 = vld [vmem:[%s656_s3 + $0x160] sm:$0xff] }
  0x10   :  { %122 = vmatpush.msra.mxu2 %v23_v26  ;;  %142 = vmatpush.msra.mxu3 %v24_v27  ;;  %v188_v44 = vld [vmem:[%s656_s3 + $0xe8] sm:$0xff]  ;;  %v219_v46 = vld [vmem:[%s656_s3 + $0x1e0] sm:$0xff]  ;;  %v202_v49 = vld [vmem:[%s656_s3 + $0x158] sm:$0xff] }
  0x11   :  { %317 = vmatmul.msk.f32.vlgmr.msra.gmra.mxu2 %vm63_vm0, %v20_v28  ;;  %318 = vmatmul.msk.f32.vlgmr.msra.gmra.mxu3 %vm63_vm0, %v20_v28  ;;  %v171_v47 = vld [vmem:[%s656_s3 + $0x60] sm:$0xff]  ;;  %v218_v50 = vld [vmem:[%s656_s3 + $0x1d8] sm:$0xff]  ;;  %v201_v53 = vld [vmem:[%s656_s3 + $0x150] sm:$0xff] }
  0x12   :  { %101 = vmatpush.msra.mxu1 %v26_v30  ;;  %267 = vmatpush.msrb.mxu2 %v206_v31  ;;  %v187_v48 = vld [vmem:[%s656_s3 + $0xe0] sm:$0xff]  ;;  %v170_v51 = vld [vmem:[%s656_s3 + $0x58] sm:$0xff]  ;;  %v217_v54 = vld [vmem:[%s656_s3 + $0x1d0] sm:$0xff] }
  0x13   :  { %287 = vmatpush.msrb.mxu3 %v222_v32  ;;  %82 = vmatpush.msra.mxu0 %v21_v33  ;;  %v186_v52 = vld [vmem:[%s656_s3 + $0xd8] sm:$0xff]  ;;  %v169_v55 = vld [vmem:[%s656_s3 + $0x50] sm:$0xff]  ;;  %v200_v57 = vld [vmem:[%s656_s3 + $0x148] sm:$0xff] }
  0x14   :  { %102 = vmatpush.msra.mxu1 %v22_v34  ;;  %315 = vmatmul.msk.f32.vlgmr.msra.gmra.mxu0 %vm63_vm0, %v20_v28  ;;  %v185_v56 = vld [vmem:[%s656_s3 + $0xd0] sm:$0xff]  ;;  %v216_v58 = vld [vmem:[%s656_s3 + $0x1c8] sm:$0xff]  ;;  %v199_v61 = vld [vmem:[%s656_s3 + $0x140] sm:$0xff] }
  0x15   :  { %316 = vmatmul.msk.f32.vlgmr.msra.gmra.mxu1 %vm63_vm0, %v20_v28  ;;  %227 = vmatpush.msrb.mxu0 %v174_v35  ;;  %v168_v59 = vld [vmem:[%s656_s3 + $0x48] sm:$0xff]  ;;  %v215_v62 = vld [vmem:[%s656_s3 + $0x1c0] sm:$0xff]  ;;  %v198_v1 = vld [vmem:[%s656_s3 + $0x138] sm:$0xff] }
  0x16   :  { %247 = vmatpush.msrb.mxu1 %v190_v36  ;;  %268 = vmatpush.msrb.mxu2 %v205_v37  ;;  %v184_v60 = vld [vmem:[%s656_s3 + $0xc8] sm:$0xff]  ;;  %v167_v63 = vld [vmem:[%s656_s3 + $0x40] sm:$0xff]  ;;  %v214_v2 = vld [vmem:[%s656_s3 + $0x1b8] sm:$0xff] }
  0x17   :  { %288 = vmatpush.msrb.mxu3 %v221_v38  ;;  %228 = vmatpush.msrb.mxu0 %v173_v39  ;;  %v183_v0 = vld [vmem:[%s656_s3 + $0xc0] sm:$0xff]  ;;  %v166_v3 = vld [vmem:[%s656_s3 + $0x38] sm:$0xff]  ;;  %v197_v5 = vld [vmem:[%s656_s3 + $0x130] sm:$0xff] }
  0x18   :  { %248 = vmatpush.msrb.mxu1 %v189_v40  ;;  %269 = vmatpush.msrb.mxu2 %v204_v41  ;;  %v182_v4 = vld [vmem:[%s656_s3 + $0xb8] sm:$0xff]  ;;  %v213_v6 = vld [vmem:[%s656_s3 + $0x1b0] sm:$0xff]  ;;  %v196_v9 = vld [vmem:[%s656_s3 + $0x128] sm:$0xff] }
  0x19   :  { %289 = vmatpush.msrb.mxu3 %v220_v42  ;;  %229 = vmatpush.msrb.mxu0 %v172_v43  ;;  %v165_v7 = vld [vmem:[%s656_s3 + $0x30] sm:$0xff]  ;;  %v212_v10 = vld [vmem:[%s656_s3 + $0x1a8] sm:$0xff]  ;;  %v195_v13 = vld [vmem:[%s656_s3 + $0x120] sm:$0xff] }
  0x1a   :  { %249 = vmatpush.msrb.mxu1 %v188_v44  ;;  %270 = vmatpush.msrb.mxu2 %v203_v45  ;;  %v181_v8 = vld [vmem:[%s656_s3 + $0xb0] sm:$0xff]  ;;  %v164_v11 = vld [vmem:[%s656_s3 + $0x28] sm:$0xff]  ;;  %v211_v14 = vld [vmem:[%s656_s3 + $0x1a0] sm:$0xff] }
  0x1b   :  { %290 = vmatpush.msrb.mxu3 %v219_v46  ;;  %230 = vmatpush.msrb.mxu0 %v171_v47  ;;  %v180_v12 = vld [vmem:[%s656_s3 + $0xa8] sm:$0xff]  ;;  %v163_v15 = vld [vmem:[%s656_s3 + $0x20] sm:$0xff]  ;;  %v194_v17 = vld [vmem:[%s656_s3 + $0x118] sm:$0xff] }
  0x1c   :  { %250 = vmatpush.msrb.mxu1 %v187_v48  ;;  %271 = vmatpush.msrb.mxu2 %v202_v49  ;;  %v179_v16 = vld [vmem:[%s656_s3 + $0xa0] sm:$0xff]  ;;  %v210_v18 = vld [vmem:[%s656_s3 + $0x198] sm:$0xff]  ;;  %v161_v20 = vld [vmem:[%s656_s3 + $0x10] sm:$0xff] }
  0x1d   :  { %291 = vmatpush.msrb.mxu3 %v218_v50  ;;  %231 = vmatpush.msrb.mxu0 %v170_v51  ;;  %v162_v19 = vld [vmem:[%s656_s3 + $0x18] sm:$0xff]  ;;  %v193_v22 = vld [vmem:[%s656_s3 + $0x110] sm:$0xff]  ;;  %v160_v24 = vld [vmem:[%s656_s3 + $0x8] sm:$0xff] }
  0x1e   :  { %251 = vmatpush.msrb.mxu1 %v186_v52  ;;  %272 = vmatpush.msrb.mxu2 %v201_v53  ;;  %v178_v21 = vld [vmem:[%s656_s3 + $0x98] sm:$0xff]  ;;  %v209_v23 = vld [vmem:[%s656_s3 + $0x190] sm:$0xff]  ;;  %v192_v26 = vld [vmem:[%s656_s3 + $0x108] sm:$0xff] }
  0x1f   :  { %292 = vmatpush.msrb.mxu3 %v217_v54  ;;  %232 = vmatpush.msrb.mxu0 %v169_v55  ;;  %v177_v25 = vld [vmem:[%s656_s3 + $0x90] sm:$0xff]  ;;  %v208_v27 = vld [vmem:[%s656_s3 + $0x188] sm:$0xff]  ;;  %v159_v28 = vld [vmem:[%s656_s3] sm:$0xff] }
  0x20   :  { %252 = vmatpush.msrb.mxu1 %v185_v56  ;;  %273 = vmatpush.msrb.mxu2 %v200_v57  ;;  %v176_v29 = vld [vmem:[%s656_s3 + $0x88] sm:$0xff]  ;;  %v191_v30 = vld [vmem:[%s656_s3 + $0x100] sm:$0xff] }
  0x21   :  { %293 = vmatpush.msrb.mxu3 %v216_v58  ;;  %233 = vmatpush.msrb.mxu0 %v168_v59  ;;  %v207_v31 = vld [vmem:[%s656_s3 + $0x180] sm:$0xff] }
  0x22   :  { %253 = vmatpush.msrb.mxu1 %v184_v60  ;;  %274 = vmatpush.msrb.mxu2 %v199_v61  ;;  %v175_v32 = vld [vmem:[%s656_s3 + $0x80] sm:$0xff] }
  0x23   :  { %294 = vmatpush.msrb.mxu3 %v215_v62  ;;  %234 = vmatpush.msrb.mxu0 %v167_v63  ;;  %v53_v33 = vld [vmem:[%s658_s2] sm:$0xf] }
  0x24   :  { %254 = vmatpush.msrb.mxu1 %v183_v0  ;;  %275 = vmatpush.msrb.mxu2 %v198_v1  ;;  %v55_v34 = vperm.slane %v53_v33, 0  ;;  %v56_v35 = vperm.slane %v53_v33, 1  ;;  %v57_v36 = vperm.slane %v53_v33, 2  ;;  %v58_v37 = vperm.slane %v53_v33, 3  ;;  %v319_v54 = vld [vmem:[%s657_s4] ss:$0 sm:$0xff] }
  0x25   :  { %295 = vmatpush.msrb.mxu3 %v214_v2  ;;  %235 = vmatpush.msrb.mxu0 %v166_v3 }
  0x26   :  { %255 = vmatpush.msrb.mxu1 %v182_v4  ;;  %276 = vmatpush.msrb.mxu2 %v197_v5 }
  0x27   :  { %296 = vmatpush.msrb.mxu3 %v213_v6  ;;  %236 = vmatpush.msrb.mxu0 %v165_v7 }
  0x28   :  { %256 = vmatpush.msrb.mxu1 %v181_v8  ;;  %277 = vmatpush.msrb.mxu2 %v196_v9 }
  0x29   :  { %297 = vmatpush.msrb.mxu3 %v212_v10  ;;  %237 = vmatpush.msrb.mxu0 %v164_v11 }
  0x2a   :  { %257 = vmatpush.msrb.mxu1 %v180_v12  ;;  %278 = vmatpush.msrb.mxu2 %v195_v13 }
  0x2b   :  { %298 = vmatpush.msrb.mxu3 %v211_v14  ;;  %238 = vmatpush.msrb.mxu0 %v163_v15 }
  0x2c   :  { %258 = vmatpush.msrb.mxu1 %v179_v16  ;;  %279 = vmatpush.msrb.mxu2 %v194_v17 }
  0x2d   :  { %299 = vmatpush.msrb.mxu3 %v210_v18  ;;  %239 = vmatpush.msrb.mxu0 %v162_v19 }
  0x2e   :  { %259 = vmatpush.msrb.mxu1 %v178_v21  ;;  %280 = vmatpush.msrb.mxu2 %v193_v22 }
  0x2f   :  { %240 = vmatpush.msrb.mxu0 %v161_v20  ;;  %300 = vmatpush.msrb.mxu3 %v209_v23 }
  0x30   :  { %260 = vmatpush.msrb.mxu1 %v177_v25  ;;  %281 = vmatpush.msrb.mxu2 %v192_v26 }
  0x31   :  { %241 = vmatpush.msrb.mxu0 %v160_v24  ;;  %301 = vmatpush.msrb.mxu3 %v208_v27 }
  0x32   :  { %261 = vmatpush.msrb.mxu1 %v176_v29  ;;  %282 = vmatpush.msrb.mxu2 %v191_v30 }
  0x33   :  { %242 = vmatpush.msrb.mxu0 %v159_v28  ;;  %302 = vmatpush.msrb.mxu3 %v207_v31 }
  0x34   :  { %262 = vmatpush.msrb.mxu1 %v175_v32 }
  0x91   :  { %v84_v38 = vpop.f32.mrf.mxu0 }
  0x92   :  { %v104_v39 = vpop.f32.mrf.mxu1  ;;  %v85_v40 = vadd.f32 %v84_v38, %v55_v34 }
  0x93   :  { %v105_v41 = vadd.f32 %v104_v39, %v56_v35 }
  0x94   :  { %v124_v42 = vpop.f32.mrf.mxu2  ;;  %v144_v43 = vpop.f32.mrf.mxu3  ;;  %v151_v44 = vmul.f32 0.01, %v85_v40  ;;  %vm147_vm1 = vcmp.gt.f32.partialorder %v85_v40, 0.0 }
  0x95   :  { %v125_v45 = vadd.f32 %v124_v42, %v57_v36  ;;  %v145_v46 = vadd.f32 %v144_v43, %v58_v37  ;;  %v152_v47 = vmul.f32 0.01, %v105_v41  ;;  %vm148_vm2 = vcmp.gt.f32.partialorder %v105_v41, 0.0 }
  0x96   :  { %v155_v50 = vsel %vm147_vm1, %v85_v40, %v151_v44 }
  0x97   :  { %v153_v48 = vmul.f32 0.01, %v125_v45  ;;  %v154_v49 = vmul.f32 0.01, %v145_v46  ;;  %vm149_vm3 = vcmp.gt.f32.partialorder %v125_v45, 0.0  ;;  %243 = vmatmul.f32.vlgmr.msrb.gmra.mxu0 %v155_v50  ;;  %vm150_vm4 = vcmp.gt.f32.partialorder %v145_v46, 0.0 }
  0x98   :  { %v156_v51 = vsel %vm148_vm2, %v105_v41, %v152_v47 }
  0x99   :  { %v157_v52 = vsel %vm149_vm3, %v125_v45, %v153_v48  ;;  %v158_v53 = vsel %vm150_vm4, %v145_v46, %v154_v49  ;;  %263 = vmatmul.f32.vlgmr.msrb.gmra.mxu1 %v156_v51 }
  0x9a   :  { %283 = vmatmul.f32.vlgmr.msrb.gmra.mxu2 %v157_v52  ;;  %303 = vmatmul.f32.vlgmr.msrb.gmra.mxu3 %v158_v53 }
 0x114   :  { %v244_v55 = vpop.f32.mrf.mxu0 }
 0x115   :  { %v245_v56 = vadd.f32 %v319_v54, %v244_v55 }
 0x116   :  { %v264_v57 = vpop.f32.mrf.mxu1 }
 0x117   :  { %v265_v58 = vadd.f32 %v264_v57, %v245_v56 }
 0x11d   :  { %v284_v59 = vpop.f32.mrf.mxu2  ;;  %v304_v61 = vpop.f32.mrf.mxu3 }
 0x11e   :  { %v285_v60 = vadd.f32 %v284_v59, %v265_v58 }
 0x120   :  { %v305_v62 = vadd.f32 %v304_v61, %v285_v60 }
 0x122   :  { %vm307_vm5 = vcmp.gt.f32.partialorder %v305_v62, 0.0  ;;  %v308_v63 = vmul.f32 0.01, %v305_v62 }
 0x124   :  { %v309_v0 = vsel %vm307_vm5, %v305_v62, %v308_v63 }
 0x125   :  { %310 = vst [vmem:[%s659_s5] sm:$0x3] %v309_v0 }

</bundles_post_ra>
